<compile_context>
chip_gen: v6e
topology: v6e:2x2x1
jax: 0.10.0
libtpu: 0.0.40
codegen_flags: <defaults>
</compile_context>

<pallas_src>
from functools import partial
from math import sqrt

import jax
import jax.numpy as jnp
from jax import lax
from jax.experimental import pallas as pl
from jax.experimental.pallas import tpu as pltpu


def _scorer_kernel(q_ref, k_ref, o_ref, *, inv_scale):
    # q_ref: (BB, TM, m), k_ref: (BB, TS, n), o_ref: (BB, TM, TS)
    q = q_ref[...]
    if inv_scale != 1.0:
        # Scale the small Q tile (BB*TM*m elements) instead of the big output.
        q = q * jnp.asarray(inv_scale, dtype=q.dtype)
    # Contract the last (hidden) dims, batch over the leading dim: the MXU
    # consumes K row-major, no explicit transpose is materialized. f32 acc.
    s = lax.dot_general(
        q, k_ref[...],
        dimension_numbers=(((2,), (2,)), ((0,), (0,))),
        preferred_element_type=jnp.float32,
    )
    o_ref[...] = s.astype(o_ref.dtype)


def _tile_candidates(dim, max_tile, align):
    """Legal block sizes for one axis, largest first.

    A block dim is legal iff it equals the full dim or is a multiple of
    `align` (8 for the sublane axis, 128 for the lane axis).
    """
    cands = [dim] if dim <= max_tile else []
    t = min(max_tile, dim - 1) // align * align  # aligned tiles strictly < dim
    while t >= align:
        cands.append(t)
        t //= 2
        t = t // align * align
    return cands or [dim]


def _select_tiles(b, tl, sl, m, in_bytes, out_bytes,
                  tm_max=512, ts_max=512, bb_max=8,
                  vmem_budget=16 * 1024 * 1024):
    """Pick (BB, TM, TS) so the double-buffered working set fits `vmem_budget`."""
    tm_opts = _tile_candidates(tl, tm_max, 8)
    ts_opts = _tile_candidates(sl, ts_max, 128)

    def working_set(bb, a, c):
        # Pipeline keeps 2 buffers of each of the Q, K and output tiles live.
        return 2 * bb * ((a + c) * m * in_bytes + a * c * out_bytes)

    ti = tj = 0
    # Shrink TM first so the output's lane dim (TS) stays large (lane-dense
    # stores are the dominant lever; v6e/v7x MXU prefers >=256-wide tiles).
    while working_set(1, tm_opts[ti], ts_opts[tj]) > vmem_budget:
        if ti + 1 < len(tm_opts):
            ti += 1
        elif tj + 1 < len(ts_opts):
            tj += 1
        else:
            break
    tm, ts = tm_opts[ti], ts_opts[tj]

    # When both sequences fit in a single tile (small heads), pack several
    # batch/head slices per grid step to amortize per-step pipeline overhead.
    bb = 1
    if tm == tl and ts == sl:
        while (bb * 2 <= min(b, bb_max)
               and working_set(bb * 2, tm, ts) <= vmem_budget):
            bb *= 2
    return bb, tm, ts


def scorer(query, keys, scaled=True, out_dtype=None, tm_max=512, ts_max=512):
    """Scaled dot-product scores.

    query: (bs, ..., target_len, m)
    keys:  (bs, ..., source_len, n) with m == n
    returns: (bs, ..., target_len, source_len)
    """
    assert query.shape[-1] == keys.shape[-1], "query/key hidden sizes must match"
    *q_lead, tl, m = query.shape
    *k_lead, sl, n = keys.shape
    assert tuple(q_lead) == tuple(k_lead), "leading (batch/head) dims must match"

    if out_dtype is None:
        out_dtype = jnp.result_type(query.dtype, keys.dtype)

    hidden_size = max(m, n)
    inv_scale = (1.0 / sqrt(hidden_size)) if scaled else 1.0

    b = 1
    for d in q_lead:
        b *= d
    b = max(b, 1)
    q3 = query.reshape(b, tl, m)
    k3 = keys.reshape(b, sl, n)

    in_bytes = max(jnp.dtype(query.dtype).itemsize, jnp.dtype(keys.dtype).itemsize)
    out_bytes = jnp.dtype(out_dtype).itemsize
    bb, tm, ts = _select_tiles(b, tl, sl, m, in_bytes, out_bytes, tm_max, ts_max)

    grid = (pl.cdiv(b, bb), pl.cdiv(tl, tm), pl.cdiv(sl, ts))

    # Advisory cost hint for XLA's scheduler around the custom call.
    flops = 2 * b * tl * sl * m
    bytes_accessed = (b * tl * m * in_bytes * grid[2]      # Q, re-read per S block
                      + b * sl * m * in_bytes * grid[1]    # K, re-read per T block
                      + b * tl * sl * out_bytes)           # scores writeback

    out = pl.pallas_call(
        partial(_scorer_kernel, inv_scale=inv_scale),
        out_shape=jax.ShapeDtypeStruct((b, tl, sl), out_dtype),
        grid_spec=pltpu.PrefetchScalarGridSpec(
            num_scalar_prefetch=0,
            grid=grid,
            in_specs=[
                # Q block is stationary across the innermost (source) axis:
                # it stays VMEM-resident instead of being re-DMA'd every step.
                pl.BlockSpec((bb, tm, m), lambda i, j, k: (i, j, 0)),
                pl.BlockSpec((bb, ts, n), lambda i, j, k: (i, k, 0)),
            ],
            out_specs=pl.BlockSpec((bb, tm, ts), lambda i, j, k: (i, j, k)),
        ),
        compiler_params=pltpu.CompilerParams(
            # Every output block is written exactly once -> all axes parallel
            # (lets the v7x megacore shard across more than just batch).
            dimension_semantics=("parallel", "parallel", "parallel"),
            vmem_limit_bytes=32 * 1024 * 1024,
        ),
        cost_estimate=pl.CostEstimate(
            flops=flops, transcendentals=0, bytes_accessed=bytes_accessed),
    )(q3, k3)

    return out.reshape(*q_lead, tl, sl)


if __name__ == "__main__":
    key = jax.random.PRNGKey(0)
    kq, kk = jax.random.split(key)

    # Small multi-head shapes consistent with the module's (bs, ..., len, m) contract.
    bs, heads, tgt_len, src_len, hidden = 2, 2, 8, 8, 32
    query = jax.random.normal(kq, (bs, heads, tgt_len, hidden), dtype=jnp.float32)
    keys = jax.random.normal(kk, (bs, heads, src_len, hidden), dtype=jnp.float32)

    scores = jax.block_until_ready(scorer(query, keys, scaled=True))
    ref = jnp.einsum("bhtd,bhsd->bhts", query, keys,
                     precision="highest") / jnp.sqrt(float(hidden))
    assert scores.shape == (bs, heads, tgt_len, src_len)
    assert jnp.allclose(scores, ref, atol=1e-5, rtol=1e-5)

    # Unscaled path.
    scores_u = jax.block_until_ready(scorer(query, keys, scaled=False))
    ref_u = jnp.einsum("bhtd,bhsd->bhts", query, keys, precision="highest")
    assert jnp.allclose(scores_u, ref_u, atol=1e-5, rtol=1e-5)

    # Exercise the tiled path: multi-block grid with partial edge tiles.
    kq2, kk2 = jax.random.split(kk)
    q2 = jax.random.normal(kq2, (1, 640, 64), dtype=jnp.float32)
    k2 = jax.random.normal(kk2, (1, 640, 64), dtype=jnp.float32)
    s2 = jax.block_until_ready(scorer(q2, k2, scaled=True))
    r2 = jnp.einsum("btd,bsd->bts", q2, k2, precision="highest") / jnp.sqrt(64.0)
    assert jnp.allclose(s2, r2, atol=1e-4, rtol=1e-4)

    # Exercise the batch-blocked path with a partial batch block (b=3, bb=2).
    kq3, kk3 = jax.random.split(kq2)
    q3_ = jax.random.normal(kq3, (3, 8, 32), dtype=jnp.float32)
    k3_ = jax.random.normal(kk3, (3, 8, 32), dtype=jnp.float32)
    s3 = jax.block_until_ready(scorer(q3_, k3_, scaled=True))
    r3 = jnp.einsum("btd,bsd->bts", q3_, k3_, precision="highest") / jnp.sqrt(32.0)
    assert jnp.allclose(s3, r3, atol=1e-5, rtol=1e-5)

    print("KERNEL_OK")
</pallas_src>

<mosaic_0001>
module attributes {stable_mosaic.version = 11 : i64} {
  func.func @_scorer_kernel(%arg0: i32, %arg1: i32, %arg2: i32, %arg3: memref<4x8x32xf32, #tpu.memory_space<vmem>>, %arg4: memref<4x8x32xf32, #tpu.memory_space<vmem>>, %arg5: memref<4x8x8xf32, #tpu.memory_space<vmem>>) attributes {dimension_semantics = [#tpu.dimension_semantics<parallel>, #tpu.dimension_semantics<parallel>, #tpu.dimension_semantics<parallel>], iteration_bounds = array<i64: 1, 1, 1>, scalar_prefetch = 0 : i64, scratch_operands = 0 : i64, tpu.core_type = #tpu.core_type<tc>, window_params = [{transform_indices = @transform_0, window_bounds = array<i64: 4, 8, 32>}, {transform_indices = @transform_1, window_bounds = array<i64: 4, 8, 32>}, {transform_indices = @transform_2, window_bounds = array<i64: 4, 8, 8>}]} {
    %c0 = arith.constant 0 : index
    %c0_0 = arith.constant 0 : index
    %c0_1 = arith.constant 0 : index
    %0 = vector.load %arg3[%c0, %c0_0, %c0_1] : memref<4x8x32xf32, #tpu.memory_space<vmem>>, vector<4x8x32xf32>
    %cst = arith.constant 0.176776692 : f32
    %1 = vector.broadcast %cst : f32 to vector<4x8x32xf32>
    %2 = arith.mulf %0, %1 : vector<4x8x32xf32>
    %c0_2 = arith.constant 0 : index
    %c0_3 = arith.constant 0 : index
    %c0_4 = arith.constant 0 : index
    %3 = vector.load %arg4[%c0_2, %c0_3, %c0_4] : memref<4x8x32xf32, #tpu.memory_space<vmem>>, vector<4x8x32xf32>
    %cst_5 = arith.constant dense<0.000000e+00> : vector<4x8x8xf32>
    %4 = tpu.matmul %2, %3, %cst_5 {dimension_numbers = #tpu.dot_dimension_numbers<[2], [2], [1], [1], [0, 0, 0, 1, 1, 1], [0], [0]>} : vector<4x8x32xf32>, vector<4x8x32xf32>, vector<4x8x8xf32> -> vector<4x8x8xf32>
    %c0_6 = arith.constant 0 : index
    %c0_7 = arith.constant 0 : index
    %c0_8 = arith.constant 0 : index
    %5 = vector.load %arg5[%c0_6, %c0_7, %c0_8] : memref<4x8x8xf32, #tpu.memory_space<vmem>>, vector<4x8x8xf32>
    tpu.vector_store %arg5[%c0_6, %c0_7, %c0_8], %4 {strides = array<i32>} : memref<4x8x8xf32, #tpu.memory_space<vmem>>, vector<4x8x8xf32>,
    return
  }
  func.func @transform_0(%arg0: i32, %arg1: i32, %arg2: i32) -> (i32, i32, i32) {
    %c0_i32 = arith.constant 0 : i32
    %c0_i32_0 = arith.constant 0 : i32
    return %arg0, %arg1, %c0_i32 : i32, i32, i32
  }
  func.func @transform_1(%arg0: i32, %arg1: i32, %arg2: i32) -> (i32, i32, i32) {
    %c0_i32 = arith.constant 0 : i32
    %c0_i32_0 = arith.constant 0 : i32
    return %arg0, %arg2, %c0_i32 : i32, i32, i32
  }
  func.func @transform_2(%arg0: i32, %arg1: i32, %arg2: i32) -> (i32, i32, i32) {
    %c0_i32 = arith.constant 0 : i32
    return %arg0, %arg1, %arg2 : i32, i32, i32
  }
}

</mosaic_0001>

<bundles_post_ra>
// kernel: tpu_custom_call.1
= control target key start
LH: loop header
LB: loop body
LE: loop exit
PB: predicated region body
PF: predicated region fallthrough
CT: control target
= control target key end

     0   :  { %7 = vsyncpa [#allocation3], 0  ;;  %s541_s0 = inlined_call_operand.hbm [shape: f32[4,8,32], index: 0, kind: input, shape index: {}]   ;;  %s542_s1 = inlined_call_operand.hbm [shape: f32[4,8,32], index: 1, kind: input, shape index: {}]   ;;  %s543_s2 = inlined_call_operand.hbm [shape: f32[4,8,8], index: 2, kind: output, shape index: {}]  }
   0x1   :  { %8 = vsyncpa [#allocation6], 0 }
   0x2   :  { %9 = vsyncpa [#allocation4], 0  ;;  %s489_s9 = smov [#allocation2]  }
   0x3   :  { %s15_s10 = sshll.u32 %s489_s9, 4  ;;  %s16_s10 = int_to_ptr.vmem [resolvable:$true] %s15_s10 }
   0x4   :  { %s431_s11 = scalar_lea.vmem %s16_s10, 512  ;;  %p436_p1 = scmp.lt.s32.totalorder %s16_s10, %s16_s10 }
   0x5   :  { %p432_p0 = scmp.ne.s32.totalorder %s16_s10, %s431_s11  ;;  %p437_p2 = scmp.lt.s32.totalorder %s431_s11, %s431_s11 }
   0x7   :  { %p438_p3 = por %p437_p2, %p436_p1 }
   0x9   :  { %p439_p4 = pnand %p438_p3, %p432_p0 }
   0xb   :  { %442 = shalt.err (!%p439_p4)
}
   0xc   :  { %s490_s12 = smov 128   ;;  %s491_s13 = smov 8  }
   0xd   :  { %21 = dma.hbm_to_vmem [thread:$0]  %s541_s0, 512, %s16_s10, [#allocation3], %s490_s12, %s490_s12, %s491_s13  }
   0xe   :  { %s492_s16 = smov [#allocation5]  }
   0xf   :  { %s27_s17 = sshll.u32 %s492_s16, 4  ;;  %s28_s17 = int_to_ptr.vmem [resolvable:$true] %s27_s17 }
  0x10   :  { %s451_s18 = scalar_lea.vmem %s28_s17, 512  ;;  %p456_p6 = scmp.lt.s32.totalorder %s28_s17, %s28_s17 }
  0x11   :  { %p452_p5 = scmp.ne.s32.totalorder %s28_s17, %s451_s18  ;;  %p457_p7 = scmp.lt.s32.totalorder %s451_s18, %s451_s18 }
  0x13   :  { %p458_p8 = por %p457_p7, %p456_p6 }
  0x15   :  { %p459_p9 = pnand %p458_p8, %p452_p5 }
  0x17   :  { %462 = shalt.err (!%p459_p9)
}
  0x18   :  { %33 = dma.hbm_to_vmem [thread:$0]  %s542_s1, 512, %s28_s17, [#allocation6], %s490_s12, %s490_s12, %s491_s13  }
  0x19   :  { %483 = dma.done.wait [#allocation3], 512  }
  0x1a   :  { %484 = vsyncadd [#allocation3], 4294966784 }
  0x1b   :  { %485 = dma.done.wait [#allocation6], 512  }
  0x1c   :  { %486 = vsyncadd [#allocation6], 4294966784  ;;  %v493_v0 = vmov 0.0   ;;  %vm494_vm0 = vmmov 0   ;;  %vm52_vm1 = vcmask 261120   ;;  %v48_v1 = vld [vmem:[#allocation5] sm:$0xff] }
  0x1d   :  { %396 = vmatprep.subr.mxu0 %v493_v0  ;;  %401 = vmatprep.subr.mxu1 %v493_v0  ;;  %v49_v2 = vld [vmem:[#allocation5 + $0x8] sm:$0xff]  ;;  %v40_v3 = vld [vmem:[#allocation2] sm:$0xff]  ;;  %v50_v6 = vld [vmem:[#allocation5 + $0x10] sm:$0xff]  ;;  %vm357_vm2 = vcmask 64512   ;;  %s495_s0 = smov [#allocation7]  }
  0x1e   :  { %398 = vmatprep.mubr.msk.f32.mxu0 %vm494_vm0, %v493_v0  ;;  %403 = vmatprep.mubr.msk.f32.mxu1 %vm494_vm0, %v493_v0  ;;  %v44_v4 = vmul.f32 0.17677669, %v40_v3  ;;  %v41_v5 = vld [vmem:[#allocation2 + $0x8] sm:$0xff]  ;;  %v51_v8 = vld [vmem:[#allocation5 + $0x18] sm:$0xff]  ;;  %v42_v9 = vld [vmem:[#allocation2 + $0x10] sm:$0xff]  ;;  %s367_s1 = sshll.u32 %s495_s0, 4  ;;  %s368_s1 = int_to_ptr.vmem [resolvable:$true] %s367_s1 }
  0x1f   :  { %397 = vmatpush3.xpose.msk.msra.mxu0 %vm52_vm1, %v48_v1  ;;  %402 = vmatpush3.xpose.msk.msra.mxu1 %vm52_vm1, %v49_v2  ;;  %v45_v7 = vmul.f32 0.17677669, %v41_v5  ;;  %v43_v10 = vld [vmem:[#allocation2 + $0x18] sm:$0xff]  ;;  %v46_v11 = vmul.f32 0.17677669, %v42_v9  ;;  %s463_s21 = scalar_lea.vmem %s368_s1, 512  ;;  %p468_p11 = scmp.lt.s32.totalorder %s368_s1, %s368_s1 }
  0x20   :  { %406 = vmatprep.subr.mxu0 %v493_v0  ;;  %411 = vmatprep.subr.mxu1 %v493_v0  ;;  %v47_v12 = vmul.f32 0.17677669, %v43_v10  ;;  %p464_p10 = scmp.ne.s32.totalorder %s368_s1, %s463_s21  ;;  %p469_p12 = scmp.lt.s32.totalorder %s463_s21, %s463_s21 }
  0x22   :  { %399 = vmatmul.mubr.msk.f32.vlgmr.msra.gmra.mxu0 %vm52_vm1, %v44_v4  ;;  %404 = vmatmul.mubr.msk.f32.vlgmr.msra.gmra.mxu1 %vm52_vm1, %v45_v7  ;;  %p470_p13 = por %p469_p12, %p468_p11 }
  0x23   :  { %407 = vmatpush3.xpose.msk.msra.mxu0 %vm52_vm1, %v50_v6  ;;  %412 = vmatpush3.xpose.msk.msra.mxu1 %vm52_vm1, %v51_v8 }
  0x24   :  { %408 = vmatprep.mubr.msk.f32.mxu0 %vm494_vm0, %v493_v0  ;;  %413 = vmatprep.mubr.msk.f32.mxu1 %vm494_vm0, %v493_v0  ;;  %p471_p0 = pnand %p470_p13, %p464_p10 }
  0x26   :  { %409 = vmatmul.mubr.msk.f32.vlgmr.msra.gmra.mxu0 %vm52_vm1, %v46_v11  ;;  %414 = vmatmul.mubr.msk.f32.vlgmr.msra.gmra.mxu1 %vm52_vm1, %v47_v12 }
  0xe2   :  { %v125_v13 = vpop.f32.mrf.mxu0  ;;  %v201_v14 = vpop.f32.mrf.mxu1 }
  0xe3   :  { %358 = vst.msk [vmem:[#allocation7] sm:$0xff] %vm357_vm2, %v125_v13  ;;  %359 = vst.msk [vmem:[#allocation7 + $0x8] sm:$0xff] %vm357_vm2, %v201_v14 }
  0xe4   :  { %v400_v15 = vpop.f32.mrf.mxu0  ;;  %v405_v16 = vpop.f32.mrf.mxu1 }
  0xe6   :  { %v277_v17 = vpop.f32.mrf.mxu0  ;;  %v353_v18 = vpop.f32.mrf.mxu1 }
  0xe7   :  { %360 = vst.msk [vmem:[#allocation7 + $0x10] sm:$0xff] %vm357_vm2, %v277_v17  ;;  %361 = vst.msk [vmem:[#allocation7 + $0x18] sm:$0xff] %vm357_vm2, %v353_v18 }
  0xe8   :  { %v410_v19 = vpop.f32.mrf.mxu0  ;;  %v415_v20 = vpop.f32.mrf.mxu1 }
  0xe9   :  { %474 = shalt.err (!%p471_p0)
}
  0xea   :  { %373 = dma.vmem_to_hbm [thread:$0]  %s368_s1, 512, %s543_s2, [#allocation4], %s490_s12, %s490_s12, %s491_s13  }
  0xeb   :  { %487 = dma.done.wait [#allocation4], 512  }
  0xec   :  { %488 = vsyncadd [#allocation4], 4294966784 }
  0xed   :  { %377 = vsyncpa [#allocation3], 1 }
  0xee   :  { %378 = vsyncpa [#allocation6], 1 }
  0xef   :  { %379 = vsyncpa [#allocation4], 1 }

</bundles_post_ra>
